<compile_context>
chip_gen: v7x
topology: tpu7x:2x2x1
jax: 0.10.0
libtpu: 0.0.40
codegen_flags: <defaults>
</compile_context>

<pallas_src>
import functools

import jax
import jax.numpy as jnp
from jax.experimental import pallas as pl
from jax.experimental.pallas import tpu as pltpu


# Raised scoped-VMEM limit (defaults are 16/32 MiB).  48 MiB leaves headroom on
# v7x's 64 MiB physical VMEM and is comfortably below v5e/v6e's 128 MiB.
_VMEM_LIMIT_BYTES = 48 * 1024 * 1024

# MXU-friendly tile constants (multiples of 256 feed the 256-wide v6e/v7x MXU);
# they are clamped to the full extent at small shapes.
_DEFAULT_SEQ_TILE = 256
_DEFAULT_VOCAB_TILE = 2048


def _layer_norm_f32(x, gamma, beta, eps):
    """LayerNorm with statistics computed in float32; returns float32."""
    x = x.astype(jnp.float32)
    mu = jnp.mean(x, axis=-1, keepdims=True)
    var = jnp.mean(jnp.square(x - mu), axis=-1, keepdims=True)
    return (x - mu) * jax.lax.rsqrt(var + eps) * gamma + beta


def _gelu(x):
    # TODO(synk): `gelu` is an unqualified import in days/gpt2.py; the GPT-2 tanh
    # approximation is assumed here.
    return 0.5 * x * (1.0 + jnp.tanh(0.7978845608028654 * (x + 0.044715 * x * x * x)))


# --------------------------------------------------------------------------------------
# Kernels
# --------------------------------------------------------------------------------------

def attention_kernel(x_ref, ln1g_ref, ln1b_ref, wqkv_ref, bqkv_ref,
                     wproj_ref, bproj_ref, out_ref, acc_ref, *, eps):
    """One (batch, head) grid step: this head's contribution to LN1->attn->c_proj,
    accumulated over the head grid axis; residual added at head 0."""
    head = pl.program_id(1)
    num_heads = pl.num_programs(1)

    x = x_ref[0]                                   # (S, H) bf16
    S = x.shape[0]
    head_size = wqkv_ref.shape[-1]
    cdt = x.dtype                                  # bf16 MXU-input dtype

    xn = _layer_norm_f32(x, ln1g_ref[...], ln1b_ref[...], eps).astype(cdt)

    w3 = wqkv_ref[0]                               # (3, H, head_size) bf16
    b3 = bqkv_ref[0]                               # (3, 1, head_size) f32
    q = jnp.dot(xn, w3[0], preferred_element_type=jnp.float32) + b3[0]   # (S, hd)
    k = jnp.dot(xn, w3[1], preferred_element_type=jnp.float32) + b3[1]
    v = jnp.dot(xn, w3[2], preferred_element_type=jnp.float32) + b3[2]

    # scores[t, f] = q[t] . k[f] / sqrt(head_size).  The contraction over the
    # channel axis is expressed through dimension_numbers -> no explicit transpose.
    scores = jax.lax.dot_general(
        q.astype(cdt), k.astype(cdt),
        dimension_numbers=(((1,), (1,)), ((), ())),
        preferred_element_type=jnp.float32) * (1.0 / float(head_size) ** 0.5)

    # causal mask: query t attends to key f iff t >= f; masked logits get -10000.0
    # exactly like the reference (tril mask + masked_bias).
    t_idx = jax.lax.broadcasted_iota(jnp.int32, (S, S), 0)
    f_idx = jax.lax.broadcasted_iota(jnp.int32, (S, S), 1)
    scores = jnp.where(t_idx >= f_idx, scores, jnp.float32(-10000.0))

    # softmax over the key axis (f) in float32.
    m = jnp.max(scores, axis=-1, keepdims=True)
    e = jnp.exp(scores - m)
    p = e * pl.reciprocal(jnp.sum(e, axis=-1, keepdims=True), approx=True)

    # ctx[t, c] = sum_f p[t, f] * v[f, c]  (again no transpose)
    ctx = jnp.dot(p.astype(cdt), v.astype(cdt), preferred_element_type=jnp.float32)

    # This head's slice of c_proj: ctx @ Wproj[h*hd:(h+1)*hd, :] -> (S, H).
    contrib = jnp.dot(ctx.astype(cdt), wproj_ref[0],
                      preferred_element_type=jnp.float32)

    @pl.when(head == 0)
    def _():
        # residual + c_proj bias, added exactly once.
        acc_ref[...] = x.astype(jnp.float32) + bproj_ref[...]

    acc_ref[...] += contrib

    @pl.when(head == num_heads - 1)
    def _():
        out_ref[0] = acc_ref[...].astype(out_ref.dtype)

    # TODO(synk): for S >= ~512 switch to a flash-style key-block loop with running
    # max/sum instead of materializing the full (S, S) score matrix.


def mlp_kernel(x_ref, ln2g_ref, ln2b_ref, w1_ref, b1_ref, w2_ref, b2_ref,
               out_ref, *, eps):
    x = x_ref[0]                                   # (TS, H) bf16
    cdt = x.dtype
    xn = _layer_norm_f32(x, ln2g_ref[...], ln2b_ref[...], eps).astype(cdt)
    a = jnp.dot(xn, w1_ref[...], preferred_element_type=jnp.float32) + b1_ref[...]
    a = _gelu(a)
    y = jnp.dot(a.astype(cdt), w2_ref[...], preferred_element_type=jnp.float32) + b2_ref[...]
    out_ref[0] = (x.astype(jnp.float32) + y).astype(out_ref.dtype)


def final_layernorm_kernel(x_ref, g_ref, b_ref, out_ref, *, eps):
    out_ref[0] = _layer_norm_f32(x_ref[0], g_ref[...], b_ref[...], eps).astype(out_ref.dtype)


def logits_kernel(enc_ref, wte_ref, out_ref):
    # logits[..., j] = sum_i enc[..., i] * wte[j, i]   (tied embedding), per V-tile.
    out_ref[0] = jax.lax.dot_general(
        enc_ref[0], wte_ref[...],
        dimension_numbers=(((1,), (1,)), ((), ())),
        preferred_element_type=jnp.float32).astype(out_ref.dtype)


# --------------------------------------------------------------------------------------
# pallas_call wrappers
# --------------------------------------------------------------------------------------

def _const_spec(shape):
    """Block spec for a weight that is fully resident and constant over the grid."""
    n = len(shape)
    return pl.BlockSpec(shape, lambda *args, _n=n: (0,) * _n)


def run_attention(x, ln1_g, ln1_b, w_qkv, b_qkv, w_proj, b_proj, *, eps):
    B, S, H = x.shape
    NH, _, _, HD = w_qkv.shape
    kernel = functools.partial(attention_kernel, eps=eps)
    return pl.pallas_call(
        kernel,
        out_shape=jax.ShapeDtypeStruct((B, S, H), x.dtype),
        grid_spec=pltpu.PrefetchScalarGridSpec(
            num_scalar_prefetch=0,
            grid=(B, NH),                            # head axis = reduction, kept last
            in_specs=[
                pl.BlockSpec((1, S, H), lambda b, h: (b, 0, 0)),          # x (resident over h)
                _const_spec(ln1_g.shape),
                _const_spec(ln1_b.shape),
                pl.BlockSpec((1, 3, H, HD), lambda b, h: (h, 0, 0, 0)),   # per-head qkv weights
                pl.BlockSpec((1, 3, 1, HD), lambda b, h: (h, 0, 0, 0)),   # per-head qkv bias
                pl.BlockSpec((1, HD, H), lambda b, h: (h, 0, 0)),         # per-head c_proj slice
                _const_spec(b_proj.shape),
            ],
            out_specs=pl.BlockSpec((1, S, H), lambda b, h: (b, 0, 0)),
            scratch_shapes=[pltpu.VMEM((S, H), jnp.float32)],             # f32 accumulator
        ),
        compiler_params=pltpu.CompilerParams(
            dimension_semantics=("parallel", "arbitrary"),
            vmem_limit_bytes=_VMEM_LIMIT_BYTES),
    )(x, ln1_g, ln1_b, w_qkv, b_qkv, w_proj, b_proj)


def run_mlp(x, ln2_g, ln2_b, w1, b1, w2, b2, *, eps, seq_tile=_DEFAULT_SEQ_TILE):
    B, S, H = x.shape
    TS = min(seq_tile, S)
    assert S % TS == 0
    kernel = functools.partial(mlp_kernel, eps=eps)
    return pl.pallas_call(
        kernel,
        out_shape=jax.ShapeDtypeStruct((B, S, H), x.dtype),
        grid_spec=pltpu.PrefetchScalarGridSpec(
            num_scalar_prefetch=0,
            grid=(B, S // TS),
            in_specs=[
                pl.BlockSpec((1, TS, H), lambda b, s: (b, s, 0)),
                _const_spec(ln2_g.shape), _const_spec(ln2_b.shape),
                _const_spec(w1.shape), _const_spec(b1.shape),
                _const_spec(w2.shape), _const_spec(b2.shape),
            ],
            out_specs=pl.BlockSpec((1, TS, H), lambda b, s: (b, s, 0)),
        ),
        compiler_params=pltpu.CompilerParams(
            dimension_semantics=("parallel", "parallel"),
            vmem_limit_bytes=_VMEM_LIMIT_BYTES),
    )(x, ln2_g, ln2_b, w1, b1, w2, b2)


def run_final_layernorm(x, g, b, *, eps, seq_tile=_DEFAULT_SEQ_TILE):
    B, S, H = x.shape
    TS = min(seq_tile, S)
    assert S % TS == 0
    kernel = functools.partial(final_layernorm_kernel, eps=eps)
    return pl.pallas_call(
        kernel,
        out_shape=jax.ShapeDtypeStruct((B, S, H), x.dtype),
        grid_spec=pltpu.PrefetchScalarGridSpec(
            num_scalar_prefetch=0,
            grid=(B, S // TS),
            in_specs=[pl.BlockSpec((1, TS, H), lambda b, s: (b, s, 0)),
                      _const_spec(g.shape), _const_spec(b.shape)],
            out_specs=pl.BlockSpec((1, TS, H), lambda b, s: (b, s, 0)),
        ),
        compiler_params=pltpu.CompilerParams(
            dimension_semantics=("parallel", "parallel"),
            vmem_limit_bytes=_VMEM_LIMIT_BYTES),
    )(x, g, b)


def run_logits(enc, wte, *, vocab_tile=_DEFAULT_VOCAB_TILE, out_dtype=jnp.float32):
    B, S, H = enc.shape
    V = wte.shape[0]
    TV = min(vocab_tile, V)
    # TODO(synk): real GPT-2's vocab (50257) is not a multiple of the tile; pad the
    # embedding table to a multiple of vocab_tile and slice the logits afterwards.
    assert V % TV == 0
    # On bandwidth-bound v5e, passing out_dtype=jnp.bfloat16 halves the (B,S,V)
    # logits writeback; float32 is kept as the default to match the reference.
    return pl.pallas_call(
        logits_kernel,
        out_shape=jax.ShapeDtypeStruct((B, S, V), out_dtype),
        grid_spec=pltpu.PrefetchScalarGridSpec(
            num_scalar_prefetch=0,
            grid=(B, V // TV),
            in_specs=[pl.BlockSpec((1, S, H), lambda b, v: (b, 0, 0)),
                      pl.BlockSpec((TV, H), lambda b, v: (v, 0))],
            out_specs=pl.BlockSpec((1, S, TV), lambda b, v: (b, 0, v)),
        ),
        compiler_params=pltpu.CompilerParams(
            dimension_semantics=("parallel", "parallel"),
            vmem_limit_bytes=_VMEM_LIMIT_BYTES),
    )(enc, wte)


# --------------------------------------------------------------------------------------
# Parameters & forward
# --------------------------------------------------------------------------------------

def init_gpt2_params(key, *, num_layers, hidden, num_heads, vocab, max_pos,
                     init_range=0.02, param_dtype=jnp.bfloat16):
    H = hidden
    hd = H // num_heads
    keys = jax.random.split(key, 2 + num_layers)
    wte = (jax.random.normal(keys[0], (vocab, H), jnp.float32) * init_range).astype(param_dtype)
    wpe = (jax.random.normal(keys[1], (max_pos, H), jnp.float32) * init_range).astype(param_dtype)

    layers = []
    for l in range(num_layers):
        ks = jax.random.split(keys[2 + l], 4)
        # PyTorch Linear weights are (out, in); pre-transpose to (in, out) and
        # pre-split q/k/v and c_proj per head (removes in-kernel lane slicing).
        w_attn_pt = jax.random.normal(ks[0], (3 * H, H), jnp.float32) * init_range
        w_qkv = jnp.transpose(w_attn_pt.T.reshape(H, 3, num_heads, hd),
                              (2, 1, 0, 3)).astype(param_dtype)          # (nh, 3, H, hd)
        b_qkv = jnp.zeros((num_heads, 3, 1, hd), jnp.float32)
        w_proj_pt = jax.random.normal(ks[1], (H, H), jnp.float32) * init_range
        w_proj = w_proj_pt.T.reshape(num_heads, hd, H).astype(param_dtype)  # (nh, hd, H)
        b_proj = jnp.zeros((1, H), jnp.float32)
        w1 = (jax.random.normal(ks[2], (4 * H, H), jnp.float32) * init_range).T.astype(param_dtype)
        b1 = jnp.zeros((1, 4 * H), jnp.float32)
        w2 = (jax.random.normal(ks[3], (H, 4 * H), jnp.float32) * init_range).T.astype(param_dtype)
        b2 = jnp.zeros((1, H), jnp.float32)
        ln1_g = jnp.ones((1, H), jnp.float32)
        ln1_b = jnp.zeros((1, H), jnp.float32)
        ln2_g = jnp.ones((1, H), jnp.float32)
        ln2_b = jnp.zeros((1, H), jnp.float32)
        layers.append((ln1_g, ln1_b, w_qkv, b_qkv, w_proj, b_proj,
                       ln2_g, ln2_b, w1, b1, w2, b2))

    lnf_g = jnp.ones((1, H), jnp.float32)
    lnf_b = jnp.zeros((1, H), jnp.float32)
    return dict(wte=wte, wpe=wpe, layers=layers, lnf_g=lnf_g, lnf_b=lnf_b)


def gpt2_forward(input_ids, params, *, eps,
                 seq_tile=_DEFAULT_SEQ_TILE, vocab_tile=_DEFAULT_VOCAB_TILE,
                 logits_dtype=jnp.float32):
    wte = params["wte"]
    wpe = params["wpe"]
    B, S = input_ids.shape

    # Embedding lookups (plain JAX gather glue); dropout layers are identity (eval).
    x = (jnp.take(wte, input_ids, axis=0) + wpe[:S][None, :, :]).astype(wte.dtype)

    # TODO(synk): cross-pallas_call prefetch of layer l+1's weights (DMA future)
    # would hide the per-layer HBM weight fetch; bf16 storage already halves it.
    for lp in params["layers"]:
        (ln1_g, ln1_b, w_qkv, b_qkv, w_proj, b_proj,
         ln2_g, ln2_b, w1, b1, w2, b2) = lp
        x = run_attention(x, ln1_g, ln1_b, w_qkv, b_qkv, w_proj, b_proj, eps=eps)
        x = run_mlp(x, ln2_g, ln2_b, w1, b1, w2, b2, eps=eps, seq_tile=seq_tile)

    enc = run_final_layernorm(x, params["lnf_g"], params["lnf_b"], eps=eps, seq_tile=seq_tile)
    logits = run_logits(enc, wte, vocab_tile=vocab_tile, out_dtype=logits_dtype)
    final_encoding = enc[:, -1, :].astype(jnp.float32)
    return logits, final_encoding


# --------------------------------------------------------------------------------------
# Pure-JAX float32 reference (for the numerical sanity check)
# --------------------------------------------------------------------------------------

def _reference_forward(input_ids, params, eps):
    f32 = lambda a: a.astype(jnp.float32)
    wte = f32(params["wte"])
    wpe = f32(params["wpe"])
    S = input_ids.shape[1]
    x = jnp.take(wte, input_ids, axis=0) + wpe[:S][None, :, :]
    t_idx = jnp.arange(S)[:, None]
    f_idx = jnp.arange(S)[None, :]
    for lp in params["layers"]:
        (ln1_g, ln1_b, w_qkv, b_qkv, w_proj, b_proj,
         ln2_g, ln2_b, w1, b1, w2, b2) = lp
        h = _layer_norm_f32(x, f32(ln1_g), f32(ln1_b), eps)
        wq, wk, wv = f32(w_qkv[:, 0]), f32(w_qkv[:, 1]), f32(w_qkv[:, 2])   # (nh, H, hd)
        bq, bk, bv = f32(b_qkv[:, 0]), f32(b_qkv[:, 1]), f32(b_qkv[:, 2])   # (nh, 1, hd)
        q = jnp.einsum('bsi,hic->bhsc', h, wq) + bq[None]
        k = jnp.einsum('bsi,hic->bhsc', h, wk) + bk[None]
        v = jnp.einsum('bsi,hic->bhsc', h, wv) + bv[None]
        hd = q.shape[-1]
        s = jnp.einsum('bhtc,bhfc->bhtf', q, k) / jnp.sqrt(jnp.float32(hd))
        s = jnp.where(t_idx >= f_idx, s, -10000.0)
        p = jax.nn.softmax(s, axis=-1)
        ctx = jnp.einsum('bhtf,bhfc->bhtc', p, v)
        attn = jnp.einsum('bhtc,hco->bto', ctx, f32(w_proj)) + f32(b_proj)
        x = x + attn
        h2 = _layer_norm_f32(x, f32(ln2_g), f32(ln2_b), eps)
        a = _gelu(h2 @ f32(w1) + f32(b1))
        x = x + (a @ f32(w2) + f32(b2))
    enc = _layer_norm_f32(x, f32(params["lnf_g"]), f32(params["lnf_b"]), eps)
    logits = jnp.einsum('bsi,vi->bsv', enc, wte)
    return logits, enc[:, -1, :]


if __name__ == "__main__":
    # Small, forward-consistent config.
    B, S = 2, 8
    HIDDEN, NUM_HEADS, NUM_LAYERS = 32, 4, 2
    VOCAB, MAX_POS = 64, 16
    EPS = 1e-5

    key = jax.random.PRNGKey(0)
    k_params, k_ids = jax.random.split(key)

    params = init_gpt2_params(k_params, num_layers=NUM_LAYERS, hidden=HIDDEN,
                              num_heads=NUM_HEADS, vocab=VOCAB, max_pos=MAX_POS)
    input_ids = jax.random.randint(k_ids, (B, S), 0, VOCAB, dtype=jnp.int32)

    logits, final_encoding = gpt2_forward(input_ids, params, eps=EPS)
    jax.block_until_ready((logits, final_encoding))

    assert logits.shape == (B, S, VOCAB)
    assert final_encoding.shape == (B, HIDDEN)

    # Numerical sanity check against a pure-JAX float32 reference (loose tolerance
    # since the kernels store weights/activations in bfloat16).
    ref_logits, ref_final = _reference_forward(input_ids, params, EPS)
    assert jnp.allclose(logits, ref_logits, rtol=5e-2, atol=5e-2), \
        float(jnp.max(jnp.abs(logits - ref_logits)))
    assert jnp.allclose(final_encoding, ref_final, rtol=5e-2, atol=5e-2), \
        float(jnp.max(jnp.abs(final_encoding - ref_final)))

    print("KERNEL_OK")
</pallas_src>

<mosaic_0001>
module attributes {stable_mosaic.version = 11 : i64} {
  func.func @attention_kernel(%arg0: i32, %arg1: i32, %arg2: memref<1x8x32xbf16, #tpu.memory_space<vmem>>, %arg3: memref<1x32xf32, #tpu.memory_space<vmem>>, %arg4: memref<1x32xf32, #tpu.memory_space<vmem>>, %arg5: memref<1x3x32x8xbf16, #tpu.memory_space<vmem>>, %arg6: memref<1x3x1x8xf32, #tpu.memory_space<vmem>>, %arg7: memref<1x8x32xbf16, #tpu.memory_space<vmem>>, %arg8: memref<1x32xf32, #tpu.memory_space<vmem>>, %arg9: memref<1x8x32xbf16, #tpu.memory_space<vmem>>, %arg10: memref<8x32xf32, #tpu.memory_space<vmem>>) attributes {dimension_semantics = [#tpu.dimension_semantics<parallel>, #tpu.dimension_semantics<arbitrary>], iteration_bounds = array<i64: 2, 4>, scalar_prefetch = 0 : i64, scratch_operands = 1 : i64, tpu.core_type = #tpu.core_type<tc>, window_params = [{transform_indices = @transform_0, window_bounds = array<i64: 1, 8, 32>}, {pipeline_mode = #tpu.pipeline_mode<synchronous>, transform_indices = @transform_1, window_bounds = array<i64: 1, 32>}, {pipeline_mode = #tpu.pipeline_mode<synchronous>, transform_indices = @transform_2, window_bounds = array<i64: 1, 32>}, {transform_indices = @transform_3, window_bounds = array<i64: 1, 3, 32, 8>}, {transform_indices = @transform_4, window_bounds = array<i64: 1, 3, 1, 8>}, {transform_indices = @transform_5, window_bounds = array<i64: 1, 8, 32>}, {pipeline_mode = #tpu.pipeline_mode<synchronous>, transform_indices = @transform_6, window_bounds = array<i64: 1, 32>}, {transform_indices = @transform_7, window_bounds = array<i64: 1, 8, 32>}]} {
    %c0 = arith.constant 0 : index
    %c0_0 = arith.constant 0 : index
    %c0_1 = arith.constant 0 : index
    %0 = vector.load %arg2[%c0, %c0_0, %c0_1] : memref<1x8x32xbf16, #tpu.memory_space<vmem>>, vector<1x8x32xbf16>
    %1 = vector.shape_cast %0 : vector<1x8x32xbf16> to vector<8x32xbf16>
    %c0_2 = arith.constant 0 : index
    %c0_3 = arith.constant 0 : index
    %2 = vector.load %arg3[%c0_2, %c0_3] : memref<1x32xf32, #tpu.memory_space<vmem>>, vector<1x32xf32>
    %c0_4 = arith.constant 0 : index
    %c0_5 = arith.constant 0 : index
    %3 = vector.load %arg4[%c0_4, %c0_5] : memref<1x32xf32, #tpu.memory_space<vmem>>, vector<1x32xf32>
    %4 = arith.extf %1 : vector<8x32xbf16> to vector<8x32xf32>
    %cst = arith.constant dense<0.000000e+00> : vector<8xf32>
    %5 = vector.multi_reduction <add>, %4, %cst [1] : vector<8x32xf32> to vector<8xf32>
    %6 = vector.shape_cast %5 : vector<8xf32> to vector<8x1xf32>
    %cst_6 = arith.constant 3.200000e+01 : f32
    %7 = vector.broadcast %cst_6 : f32 to vector<8x1xf32>
    %8 = arith.divf %6, %7 : vector<8x1xf32>
    %9 = vector.broadcast %8 : vector<8x1xf32> to vector<8x32xf32>
    %10 = arith.subf %4, %9 : vector<8x32xf32>
    %11 = arith.mulf %10, %10 : vector<8x32xf32>
    %cst_7 = arith.constant dense<0.000000e+00> : vector<8xf32>
    %12 = vector.multi_reduction <add>, %11, %cst_7 [1] : vector<8x32xf32> to vector<8xf32>
    %13 = vector.shape_cast %12 : vector<8xf32> to vector<8x1xf32>
    %cst_8 = arith.constant 3.200000e+01 : f32
    %14 = vector.broadcast %cst_8 : f32 to vector<8x1xf32>
    %15 = arith.divf %13, %14 : vector<8x1xf32>
    %16 = vector.broadcast %8 : vector<8x1xf32> to vector<8x32xf32>
    %17 = arith.subf %4, %16 : vector<8x32xf32>
    %cst_9 = arith.constant 9.99999974E-6 : f32
    %18 = vector.broadcast %cst_9 : f32 to vector<8x1xf32>
    %19 = arith.addf %15, %18 : vector<8x1xf32>
    %20 = math.rsqrt %19 : vector<8x1xf32>
    %21 = vector.broadcast %20 : vector<8x1xf32> to vector<8x32xf32>
    %22 = arith.mulf %17, %21 : vector<8x32xf32>
    %23 = vector.broadcast %2 : vector<1x32xf32> to vector<8x32xf32>
    %24 = arith.mulf %22, %23 : vector<8x32xf32>
    %25 = vector.broadcast %3 : vector<1x32xf32> to vector<8x32xf32>
    %26 = arith.addf %24, %25 : vector<8x32xf32>
    %27 = arith.truncf %26 : vector<8x32xf32> to vector<8x32xbf16>
    %c0_10 = arith.constant 0 : index
    %c0_11 = arith.constant 0 : index
    %c0_12 = arith.constant 0 : index
    %c0_13 = arith.constant 0 : index
    %28 = vector.load %arg5[%c0_10, %c0_11, %c0_12, %c0_13] : memref<1x3x32x8xbf16, #tpu.memory_space<vmem>>, vector<1x3x32x8xbf16>
    %29 = vector.shape_cast %28 : vector<1x3x32x8xbf16> to vector<3x32x8xbf16>
    %c0_14 = arith.constant 0 : index
    %c0_15 = arith.constant 0 : index
    %c0_16 = arith.constant 0 : index
    %c0_17 = arith.constant 0 : index
    %30 = vector.load %arg6[%c0_14, %c0_15, %c0_16, %c0_17] : memref<1x3x1x8xf32, #tpu.memory_space<vmem>>, vector<1x3x1x8xf32>
    %31 = vector.shape_cast %30 : vector<1x3x1x8xf32> to vector<3x1x8xf32>
    %32 = vector.extract_strided_slice %29 {offsets = [0, 0, 0], sizes = [1, 32, 8], strides = [1, 1, 1]} : vector<3x32x8xbf16> to vector<1x32x8xbf16>
    %33 = vector.shape_cast %32 : vector<1x32x8xbf16> to vector<32x8xbf16>
    %cst_18 = arith.constant dense<0.000000e+00> : vector<8x8xf32>
    %34 = tpu.matmul %27, %33, %cst_18 {dimension_numbers = #tpu.dot_dimension_numbers<[1], [0], [0], [1], [0, 0, 1, 1], [], []>} : vector<8x32xbf16>, vector<32x8xbf16>, vector<8x8xf32> -> vector<8x8xf32>
    %35 = vector.extract_strided_slice %31 {offsets = [0, 0, 0], sizes = [1, 1, 8], strides = [1, 1, 1]} : vector<3x1x8xf32> to vector<1x1x8xf32>
    %36 = vector.shape_cast %35 : vector<1x1x8xf32> to vector<1x8xf32>
    %37 = vector.broadcast %36 : vector<1x8xf32> to vector<8x8xf32>
    %38 = arith.addf %34, %37 : vector<8x8xf32>
    %39 = vector.extract_strided_slice %29 {offsets = [1, 0, 0], sizes = [1, 32, 8], strides = [1, 1, 1]} : vector<3x32x8xbf16> to vector<1x32x8xbf16>
    %40 = vector.shape_cast %39 : vector<1x32x8xbf16> to vector<32x8xbf16>
    %cst_19 = arith.constant dense<0.000000e+00> : vector<8x8xf32>
    %41 = tpu.matmul %27, %40, %cst_19 {dimension_numbers = #tpu.dot_dimension_numbers<[1], [0], [0], [1], [0, 0, 1, 1], [], []>} : vector<8x32xbf16>, vector<32x8xbf16>, vector<8x8xf32> -> vector<8x8xf32>
    %42 = vector.extract_strided_slice %31 {offsets = [1, 0, 0], sizes = [1, 1, 8], strides = [1, 1, 1]} : vector<3x1x8xf32> to vector<1x1x8xf32>
    %43 = vector.shape_cast %42 : vector<1x1x8xf32> to vector<1x8xf32>
    %44 = vector.broadcast %43 : vector<1x8xf32> to vector<8x8xf32>
    %45 = arith.addf %41, %44 : vector<8x8xf32>
    %46 = vector.extract_strided_slice %29 {offsets = [2, 0, 0], sizes = [1, 32, 8], strides = [1, 1, 1]} : vector<3x32x8xbf16> to vector<1x32x8xbf16>
    %47 = vector.shape_cast %46 : vector<1x32x8xbf16> to vector<32x8xbf16>
    %cst_20 = arith.constant dense<0.000000e+00> : vector<8x8xf32>
    %48 = tpu.matmul %27, %47, %cst_20 {dimension_numbers = #tpu.dot_dimension_numbers<[1], [0], [0], [1], [0, 0, 1, 1], [], []>} : vector<8x32xbf16>, vector<32x8xbf16>, vector<8x8xf32> -> vector<8x8xf32>
    %49 = vector.extract_strided_slice %31 {offsets = [2, 0, 0], sizes = [1, 1, 8], strides = [1, 1, 1]} : vector<3x1x8xf32> to vector<1x1x8xf32>
    %50 = vector.shape_cast %49 : vector<1x1x8xf32> to vector<1x8xf32>
    %51 = vector.broadcast %50 : vector<1x8xf32> to vector<8x8xf32>
    %52 = arith.addf %48, %51 : vector<8x8xf32>
    %53 = arith.truncf %38 : vector<8x8xf32> to vector<8x8xbf16>
    %54 = arith.truncf %45 : vector<8x8xf32> to vector<8x8xbf16>
    %cst_21 = arith.constant dense<0.000000e+00> : vector<8x8xf32>
    %55 = tpu.matmul %53, %54, %cst_21 {dimension_numbers = #tpu.dot_dimension_numbers<[1], [1], [0], [0], [0, 0, 1, 0], [], []>} : vector<8x8xbf16>, vector<8x8xbf16>, vector<8x8xf32> -> vector<8x8xf32>
    %cst_22 = arith.constant 0.353553385 : f32
    %56 = vector.broadcast %cst_22 : f32 to vector<8x8xf32>
    %57 = arith.mulf %55, %56 : vector<8x8xf32>
    %58 = tpu.iota {dimensions = array<i32: 0>} : vector<8x8xi32>
    %59 = tpu.iota {dimensions = array<i32: 1>} : vector<8x8xi32>
    %60 = arith.cmpi sge, %58, %59 : vector<8x8xi32>
    %cst_23 = arith.constant -1.000000e+04 : f32
    %61 = vector.broadcast %cst_23 : f32 to vector<8x8xf32>
    %62 = arith.select %60, %57, %61 : vector<8x8xi1>, vector<8x8xf32>
    %cst_24 = arith.constant dense<0xFF800000> : vector<8xf32>
    %63 = vector.multi_reduction <maximumf>, %62, %cst_24 [1] : vector<8x8xf32> to vector<8xf32>
    %64 = vector.shape_cast %63 : vector<8xf32> to vector<8x1xf32>
    %65 = vector.broadcast %64 : vector<8x1xf32> to vector<8x8xf32>
    %66 = arith.subf %62, %65 : vector<8x8xf32>
    %67 = math.exp %66 : vector<8x8xf32>
    %cst_25 = arith.constant dense<0.000000e+00> : vector<8xf32>
    %68 = vector.multi_reduction <add>, %67, %cst_25 [1] : vector<8x8xf32> to vector<8xf32>
    %69 = vector.shape_cast %68 : vector<8xf32> to vector<8x1xf32>
    %70 = tpu.reciprocal %69 {approx = true} : vector<8x1xf32> -> vector<8x1xf32>
    %71 = vector.broadcast %70 : vector<8x1xf32> to vector<8x8xf32>
    %72 = arith.mulf %67, %71 : vector<8x8xf32>
    %73 = arith.truncf %72 : vector<8x8xf32> to vector<8x8xbf16>
    %74 = arith.truncf %52 : vector<8x8xf32> to vector<8x8xbf16>
    %cst_26 = arith.constant dense<0.000000e+00> : vector<8x8xf32>
    %75 = tpu.matmul %73, %74, %cst_26 {dimension_numbers = #tpu.dot_dimension_numbers<[1], [0], [0], [1], [0, 0, 1, 1], [], []>} : vector<8x8xbf16>, vector<8x8xbf16>, vector<8x8xf32> -> vector<8x8xf32>
    %76 = arith.truncf %75 : vector<8x8xf32> to vector<8x8xbf16>
    %c0_27 = arith.constant 0 : index
    %c0_28 = arith.constant 0 : index
    %c0_29 = arith.constant 0 : index
    %77 = vector.load %arg7[%c0_27, %c0_28, %c0_29] : memref<1x8x32xbf16, #tpu.memory_space<vmem>>, vector<1x8x32xbf16>
    %78 = vector.shape_cast %77 : vector<1x8x32xbf16> to vector<8x32xbf16>
    %cst_30 = arith.constant dense<0.000000e+00> : vector<8x32xf32>
    %79 = tpu.matmul %76, %78, %cst_30 {dimension_numbers = #tpu.dot_dimension_numbers<[1], [0], [0], [1], [0, 0, 1, 1], [], []>} : vector<8x8xbf16>, vector<8x32xbf16>, vector<8x32xf32> -> vector<8x32xf32>
    %c0_i32 = arith.constant 0 : i32
    %80 = arith.cmpi eq, %arg1, %c0_i32 : i32
    %81 = arith.extui %80 : i1 to i32
    %c0_i32_31 = arith.constant 0 : i32
    %82 = arith.cmpi ne, %81, %c0_i32_31 : i32
    scf.if %82 {
      %89 = arith.extf %1 : vector<8x32xbf16> to vector<8x32xf32>
      %c0_37 = arith.constant 0 : index
      %c0_38 = arith.constant 0 : index
      %90 = vector.load %arg8[%c0_37, %c0_38] : memref<1x32xf32, #tpu.memory_space<vmem>>, vector<1x32xf32>
      %91 = vector.broadcast %90 : vector<1x32xf32> to vector<8x32xf32>
      %92 = arith.addf %89, %91 : vector<8x32xf32>
      %c0_39 = arith.constant 0 : index
      %c0_40 = arith.constant 0 : index
      %93 = vector.load %arg10[%c0_39, %c0_40] : memref<8x32xf32, #tpu.memory_space<vmem>>, vector<8x32xf32>
      tpu.vector_store %arg10[%c0_39, %c0_40], %92 {strides = array<i32>} : memref<8x32xf32, #tpu.memory_space<vmem>>, vector<8x32xf32>,
    } else {
    }
    %c0_32 = arith.constant 0 : index
    %c0_33 = arith.constant 0 : index
    %83 = vector.load %arg10[%c0_32, %c0_33] : memref<8x32xf32, #tpu.memory_space<vmem>>, vector<8x32xf32>
    %84 = arith.addf %83, %79 : vector<8x32xf32>
    %c0_34 = arith.constant 0 : index
    %c0_35 = arith.constant 0 : index
    %85 = vector.load %arg10[%c0_34, %c0_35] : memref<8x32xf32, #tpu.memory_space<vmem>>, vector<8x32xf32>
    tpu.vector_store %arg10[%c0_34, %c0_35], %84 {strides = array<i32>} : memref<8x32xf32, #tpu.memory_space<vmem>>, vector<8x32xf32>,
    %c3_i32 = arith.constant 3 : i32
    %86 = arith.cmpi eq, %arg1, %c3_i32 : i32
    %87 = arith.extui %86 : i1 to i32
    %c0_i32_36 = arith.constant 0 : i32
    %88 = arith.cmpi ne, %87, %c0_i32_36 : i32
    scf.if %88 {
      %c0_37 = arith.constant 0 : index
      %c0_38 = arith.constant 0 : index
      %89 = vector.load %arg10[%c0_37, %c0_38] : memref<8x32xf32, #tpu.memory_space<vmem>>, vector<8x32xf32>
      %90 = arith.truncf %89 : vector<8x32xf32> to vector<8x32xbf16>
      %c0_39 = arith.constant 0 : index
      %c0_40 = arith.constant 0 : index
      %c0_41 = arith.constant 0 : index
      %91 = vector.load %arg9[%c0_39, %c0_40, %c0_41] : memref<1x8x32xbf16, #tpu.memory_space<vmem>>, vector<1x8x32xbf16>
      %92 = vector.shape_cast %91 : vector<1x8x32xbf16> to vector<8x32xbf16>
      %93 = vector.shape_cast %90 : vector<8x32xbf16> to vector<1x8x32xbf16>
      tpu.vector_store %arg9[%c0_39, %c0_40, %c0_41], %93 {strides = array<i32>} : memref<1x8x32xbf16, #tpu.memory_space<vmem>>, vector<1x8x32xbf16>,
    } else {
    }
    return
  }
  func.func @transform_0(%arg0: i32, %arg1: i32) -> (i32, i32, i32) {
    %c0_i32 = arith.constant 0 : i32
    %c0_i32_0 = arith.constant 0 : i32
    %c0_i32_1 = arith.constant 0 : i32
    return %arg0, %c0_i32, %c0_i32_0 : i32, i32, i32
  }
  func.func @transform_1(%arg0: i32, %arg1: i32) -> (i32, i32) {
    %c0_i32 = arith.constant 0 : i32
    %c0_i32_0 = arith.constant 0 : i32
    %c0_i32_1 = arith.constant 0 : i32
    return %c0_i32, %c0_i32_0 : i32, i32
  }
  func.func @transform_2(%arg0: i32, %arg1: i32) -> (i32, i32) {
    %c0_i32 = arith.constant 0 : i32
    %c0_i32_0 = arith.constant 0 : i32
    %c0_i32_1 = arith.constant 0 : i32
    return %c0_i32, %c0_i32_0 : i32, i32
  }
  func.func @transform_3(%arg0: i32, %arg1: i32) -> (i32, i32, i32, i32) {
    %c0_i32 = arith.constant 0 : i32
    %c0_i32_0 = arith.constant 0 : i32
    %c0_i32_1 = arith.constant 0 : i32
    %c0_i32_2 = arith.constant 0 : i32
    return %arg1, %c0_i32, %c0_i32_0, %c0_i32_1 : i32, i32, i32, i32
  }
  func.func @transform_4(%arg0: i32, %arg1: i32) -> (i32, i32, i32, i32) {
    %c0_i32 = arith.constant 0 : i32
    %c0_i32_0 = arith.constant 0 : i32
    %c0_i32_1 = arith.constant 0 : i32
    %c0_i32_2 = arith.constant 0 : i32
    return %arg1, %c0_i32, %c0_i32_0, %c0_i32_1 : i32, i32, i32, i32
  }
  func.func @transform_5(%arg0: i32, %arg1: i32) -> (i32, i32, i32) {
    %c0_i32 = arith.constant 0 : i32
    %c0_i32_0 = arith.constant 0 : i32
    %c0_i32_1 = arith.constant 0 : i32
    return %arg1, %c0_i32, %c0_i32_0 : i32, i32, i32
  }
  func.func @transform_6(%arg0: i32, %arg1: i32) -> (i32, i32) {
    %c0_i32 = arith.constant 0 : i32
    %c0_i32_0 = arith.constant 0 : i32
    %c0_i32_1 = arith.constant 0 : i32
    return %c0_i32, %c0_i32_0 : i32, i32
  }
  func.func @transform_7(%arg0: i32, %arg1: i32) -> (i32, i32, i32) {
    %c0_i32 = arith.constant 0 : i32
    %c0_i32_0 = arith.constant 0 : i32
    %c0_i32_1 = arith.constant 0 : i32
    return %arg0, %c0_i32, %c0_i32_0 : i32, i32, i32
  }
}

</mosaic_0001>

<bundles_post_ra>
// kernel: tpu_custom_call.1
= control target key start
LH: loop header
LB: loop body
LE: loop exit
PB: predicated region body
PF: predicated region fallthrough
CT: control target
= control target key end

     0   :  { %s1400_s0 = inlined_call_operand.vmem [shape: bf16[2,8,32], index: 0, kind: input, shape index: {}]   ;;  %s1401_s1 = inlined_call_operand.vmem [shape: f32[1,32], index: 1, kind: input, shape index: {}]   ;;  %s1402_s2 = inlined_call_operand.vmem [shape: f32[1,32], index: 2, kind: input, shape index: {}]   ;;  %s1403_s3 = inlined_call_operand.vmem [shape: bf16[4,3,32,8], index: 3, kind: input, shape index: {}]   ;;  %s1404_s4 = inlined_call_operand.vmem [shape: f32[4,3,1,8], index: 4, kind: input, shape index: {}]   ;;  %s1405_s5 = inlined_call_operand.vmem [shape: bf16[4,8,32], index: 5, kind: input, shape index: {}]   ;;  %s1406_s6 = inlined_call_operand.vmem [shape: f32[1,32], index: 6, kind: input, shape index: {}]   ;;  %s1407_s7 = inlined_call_operand.hbm [shape: bf16[2,8,32], index: 7, kind: output, shape index: {}]  }
   0x1   :  { %1408 = sst [smem:[#allocation6_spill]] %s1400_s0 }
   0x2   :  { %12 = vsyncpa [#allocation4], 0 }
   0x3   :  { %14 = vsyncpa [#allocation4 + $0x1], 0  ;;  %s1191_s24 = smov 0   ;;  %s1193_s25 = smov 0  }
   0x4   :  { %s1195_s26 = smov 0   ;;  %s1197_s27 = smov 0  }
   0x5   :  { %s1199_s28 = smov 0   ;;  %s1201_s29 = smov 0  }
   0x6   :  { %s1203_s30 = smov 0   ;;  %s1205_s8 = smov 0  }
   0x7 LB: > { %s875_s9 = sadd.s32 4294967295, %s1146_s8   ;;  %s876_s10 = sadd.s32 4294967294, %s1146_s8   ;;  %s1146_s8 = sphi %s1205_s8, %s20_s8   ;;  %s1142_s30 = sphi %s1203_s30, %s1418_s30   ;;  %s1138_s29 = sphi %s1201_s29, %s1417_s29   ;;  %s1134_s28 = sphi %s1199_s28, %s1416_s28   ;;  %s1130_s27 = sphi %s1197_s27, %s1415_s27   ;;  %s1126_s26 = sphi %s1195_s26, %s1414_s26   ;;  %s1122_s25 = sphi %s1193_s25, %s1413_s25   ;;  %s1118_s24 = sphi %s1191_s24, %s1412_s24  }
   0x8   : > { %s29_s11 = sadd.s32 1, %s1138_s29  ;;  %s32_s12 = sadd.s32 1, %s1142_s30 }
   0x9   : > { %p30_p0 = scmp.ge.s32.totalorder %s29_s11, 4  ;;  %p216_p1 = scmp.ne.s32.totalorder %s1126_s26, %s1122_s25 }
   0xa   : > { %p217_p2 = scmp.eq.s32.totalorder %s875_s9, 7  ;;  %p222_p4 = scmp.ne.s32.totalorder %s1122_s25, %s1118_s24 }
   0xb   : > { %s1420_s11 = smov (%p30_p0, %s29_s11), 0  ;;  %s1422_s12 = smov (!%p30_p0, %s32_s12), %s1142_s30 }
   0xc   : > { %p1240_p3 = por %p217_p2, %p216_p1  ;;  %p34_p5 = scmp.ge.s32.totalorder %s1422_s12, 2 }
   0xd   : > { %p223_p6 = scmp.eq.s32.totalorder %s876_s10, 7  ;;  %p879_p7 = scmp.ge.s32.totalorder %s1146_s8, 1 }
   0xe   : > { %p279_p8 = scmp.lt.s32.totalorder %s1146_s8, 9  ;;  %s1424_s12 = smov (%p34_p5, %s1422_s12), 0 }
   0xf   : > { %p1250_p9 = por %p223_p6, %p222_p4  ;;  %s203_s15 = ssub.s32 %s1142_s30, %s1424_s12 }
  0x10   : > { %p280_p10 = pnand %p879_p7, %p279_p8  ;;  %s206_s16 = sadd.s32 1, %s1126_s26 }
  0x11   : > { %p204_p11 = scmp.eq.s32.totalorder %s203_s15, 0  ;;  %p323_p12 = scmp.lt.s32.totalorder (!%p280_p10), %s1134_s28, 1  ;;  %vm345_vm0 = vcmask (!%p280_p10), 261120   ;;  %v1148_v9 = vmov (!%p280_p10), 0.0   ;;  %vm1149_vm1 = vmmov (!%p280_p10), 0   ;;  %vm569_vm2 = vcmask (!%p280_p10), 64512  }
  0x12   : > { %283 = sbr.rel (%p280_p10) target bundleno = 1569 (0x621), region = 48  ;;  %s1411_s0 = sld [smem:[#allocation6_spill]] (!%p280_p10)  ;;  %923 = vmatprep.subr.bf16.mxu0 (!%p280_p10), %v1148_v9  ;;  %931 = vmatprep.subr.bf16.mxu1 (!%p280_p10), %v1148_v9  ;;  %v884_v17 = vld [vmem:[%s1401_s1] ss:$0 sm:$0xff] (!%p280_p10)  ;;  %vm639_vm3 = vcmask (!%p280_p10), 1043456   ;;  %v617_v48 = vlaneseq (!%p280_p10) }
  0x13   : > { %s1258_s17 = scalar_select %p204_p11, %s1126_s26, %s206_s16  }
  0x14   : > { %p327_p13 = scmp.lt.s32.totalorder (!%p280_p10), %s1130_s27, 3  ;;  %927 = vmatprep.mubr.msk.bf16.mxu0 (!%p280_p10), %vm1149_vm1, %v1148_v9  ;;  %935 = vmatprep.mubr.msk.bf16.mxu1 (!%p280_p10), %vm1149_vm1, %v1148_v9  ;;  %v885_v19 = vld [vmem:[%s1402_s2] ss:$0 sm:$0xff] (!%p280_p10)  ;;  %v618_v49 = vshrl.u32 (!%p280_p10), %v617_v48, 7  ;;  %v620_v50 = vand.u32 (!%p280_p10), 127, %v617_v48  ;;  %p901_p0 = scmp.ne.s32.totalorder (!%p280_p10), %s1130_s27, 0 }
  0x16   : > { %vm621_vm4 = vcmp.ge.s32.totalorder (!%p280_p10), %v618_v49, %v620_v50 }
  0x19   : > { %s324_s18 = scalar_select %p323_p12, %s1134_s28, 1 }
  0x1a   : > { %s1273_s23 = scalar_select %p327_p13, %s1130_s27, 3 }
  0x1b   : > { %s881_s19 = sshll.u32 %s324_s18, 2  ;;  %s320_s18 = sand.u32 1, %s1122_s25  }
  0x1c   : > { %s326_s22 = scalar_lea.vmem %s1411_s0, %s881_s19  ;;  %s965_s9 = smul.u32 48, %s1273_s23 }
  0x1d   : > { %v341_v0 = vld [vmem:[%s326_s22] sm:$0xf]  ;;  %s1288_s19 = sshll.u32 %s320_s18, 2  ;;  %s966_s10 = smul.u32 3, %s1273_s23 }
  0x1e   : > { %v1265_v1 = vunpack.c.l.bf16 %v341_v0  ;;  %s1279_s16 = scalar_lea.vmem %s1403_s3, %s965_s9  ;;  %s883_s21 = sshll.u32 %s1273_s23, 2 }
  0x1f   : > { %v1040_v8 = vld [vmem:[%s1279_s16] sm:$0xff]   ;;  %v1041_v10 = vld [vmem:[%s1279_s16 + $0x10] sm:$0xff]   ;;  %v1042_v11 = vld [vmem:[%s1279_s16 + $0x8] sm:$0xff]   ;;  %s322_s23 = scalar_lea.vmem [#allocation3], %s1288_s19 }
  0x20   : > { %v346_v2 = vsel %vm345_vm0, %v1265_v1, 0.0  ;;  %924 = vmatpush3.bf16.msra.mxu0 %v1040_v8  ;;  %932 = vmatpush3.bf16.msra.mxu1 %v1041_v10  ;;  %v1043_v12 = vld [vmem:[%s1279_s16 + $0x18] sm:$0xff]   ;;  %v1044_v22 = vld [vmem:[%s1279_s16 + $0x20] sm:$0xff]   ;;  %v1045_v24 = vld [vmem:[%s1279_s16 + $0x28] sm:$0xff]   ;;  %s335_s16 = scalar_lea.vmem %s1404_s4, %s966_s10  ;;  %s339_s10 = scalar_lea.vmem %s1405_s5, %s883_s21 }
  0x21   : > { %347 = vadd.xlane.f32.xlu0 %v346_v2  ;;  %925 = vmatprep.subr.bf16.mxu0 %v1148_v9  ;;  %v890_v25 = vld [vmem:[%s335_s16 + $0x1] ss:$0 sm:$0xff]  ;;  %v886_v36 = vld [vmem:[%s335_s16] ss:$0 sm:$0xff]  ;;  %v894_v38 = vld [vmem:[%s335_s16 + $0x2] ss:$0 sm:$0xff] }
  0x22   : > { %933 = vmatprep.subr.bf16.mxu1 %v1148_v9  ;;  %v684_v63 = vld [vmem:[%s339_s10] sm:$0xf] }
  0x23   : > { %v689_v0 = vsel %vm639_vm3, %v684_v63, 0 }
  0x24   : > { %926 = vmatpush3.bf16.msra.mxu0 %v1042_v11  ;;  %934 = vmatpush3.bf16.msra.mxu1 %v1043_v12 }
  0x25   : > { %939 = vmatprep.subr.bf16.mxu0 %v1148_v9  ;;  %947 = vmatprep.subr.bf16.mxu1 %v1148_v9 }
  0xae   : > { %v348_v3 = vpop.xlane.xlu0 %347 }
  0xaf   : > { %v350_v4 = vmul.f32 0.03125, %v348_v3 }
  0xb1   : > { %v351_v5 = vsub.f32 %v1265_v1, %v350_v4 }
  0xb3   : > { %v352_v6 = vmul.f32 %v351_v5, %v351_v5 }
  0xb5   : > { %v353_v7 = vsel %vm345_vm0, %v352_v6, 0.0 }
  0xb6   : > { %354 = vadd.xlane.f32.xlu0 %v353_v7 }
 0x143   : > { %v355_v13 = vpop.xlane.xlu0 %354 }
 0x144   : > { %v356_v14 = vmul.f32 0.03125, %v355_v13 }
 0x146   : > { %v357_v15 = vadd.f32 1e-05, %v356_v14 }
 0x148   : > { %1046 = vrsqrt.f32 %v357_v15  ;;  %v902_v15 = vld [vmem:[%s1406_s6] ss:$0 sm:$0xff] (!%p901_p0) }
 0x152   : > { %v1047_v16 = vpop.eup %1046 }
 0x153   : > { %v359_v18 = vmul.f32 %v1047_v16, %v351_v5  ;;  %v742_v16 = vadd.f32 (!%p901_p0), %v902_v15, %v1265_v1 }
 0x155   : > { %v366_v20 = vmul.f32 %v884_v17, %v359_v18  ;;  %743 = vst.msk [vmem:[#allocation2] sm:$0xff] (!%p901_p0), %vm345_vm0, %v742_v16 }
 0x157   : > { %v373_v21 = vadd.f32 %v885_v19, %v366_v20 }
 0x159   : > { %v374_v23 = vpack.c.bf16 %v373_v21, %v373_v21 }
 0x15b   : > { %928 = vmatmul.mubr.msk.bf16.vlgmr.msra.gmra.mrb[0].mxu0 %vm345_vm0, %v374_v23  ;;  %936 = vmatmul.mubr.msk.bf16.vlgmr.msra.gmra.mrb[0].mxu1 %vm345_vm0, %v374_v23 }
 0x15c   : > { %940 = vmatpush3.bf16.msra.mxu0 %v1044_v22  ;;  %943 = vmatprep.mubr.msk.bf16.mxu0 %vm1149_vm1, %v1148_v9 }
 0x15d   : > { %941 = vmatprep.subr.bf16.mxu0 %v1148_v9  ;;  %949 = vmatprep.mubr.msk.bf16.mxu1 %vm1149_vm1, %v1148_v9 }
 0x160   : > { %942 = vmatpush3.bf16.msra.mxu0 %v1045_v24 }
 0x161   : > { %953 = vmatprep.subr.bf16.mxu0 %v1148_v9 }
 0x163   : > { %944 = vmatmul.mubr.msk.bf16.vlgmr.msra.gmra.mrb[4].mxu0 %vm345_vm0, %v374_v23 }
 0x164   : > { %955 = vmatprep.mubr.msk.bf16.mxu0 %vm1149_vm1, %v1148_v9 }
 0x22e   : > { %v445_v26 = vpop.f32.mrb[0].mxu0  ;;  %v503_v27 = vpop.f32.mrb[0].mxu1 }
 0x22f   : > { %v504_v28 = vadd.f32 %v890_v25, %v503_v27  ;;  %v929_v29 = vpop.f32.mrb[1].mxu0  ;;  %v937_v30 = vpop.f32.mrb[1].mxu1  ;;  %v446_v39 = vadd.f32 %v886_v36, %v445_v26 }
 0x230   : > { %v448_v31 = vpop.f32.mrb[2].mxu0  ;;  %v506_v32 = vpop.f32.mrb[2].mxu1 }
 0x231   : > { %v568_v33 = vpack.c.bf16 %v504_v28, %v504_v28  ;;  %v930_v34 = vpop.f32.mrb[3].mxu0  ;;  %v938_v35 = vpop.f32.mrb[3].mxu1  ;;  %v567_v44 = vpack.c.bf16 %v446_v39, %v446_v39 }
 0x233   : > { %v574_v37 = vsel %vm569_vm2, %v568_v33, 0 }
 0x234   : > { %948 = vmatpush3.bf16.xpose.msra.mxu1 %v574_v37 }
 0x235   : > { %959 = vmatprep.subr.bf16.mxu1 %v1148_v9 }
 0x236   : > { %v561_v40 = vpop.f32.mrb[4].mxu0 }
 0x237   : > { %v562_v41 = vadd.f32 %v894_v38, %v561_v40  ;;  %v945_v42 = vpop.f32.mrb[5].mxu0 }
 0x238   : > { %v564_v43 = vpop.f32.mrb[6].mxu0 }
 0x239   : > { %v635_v45 = vpack.c.bf16 %v562_v41, %v562_v41  ;;  %v946_v46 = vpop.f32.mrb[7].mxu0 }
 0x23b   : > { %v641_v47 = vsel %vm639_vm3, %v635_v45, 0  ;;  %950 = vmatmul.mubr.msk.bf16.vlgmr.msra.gmra.mrb[4].mxu1 %vm569_vm2, %v567_v44 }
 0x23c   : > { %954 = vmatpush3.bf16.msra.mxu0 %v641_v47  ;;  %961 = vmatprep.mubr.msk.bf16.mxu1 %vm1149_vm1, %v1148_v9 }
 0x23d   : > { %960 = vmatpush3.bf16.msra.mxu1 %v689_v0 }
 0x30e   : > { %v610_v51 = vpop.f32.mrb[4].mxu1 }
 0x30f   : > { %v616_v52 = vmul.f32 0.35355338, %v610_v51  ;;  %v951_v53 = vpop.f32.mrb[5].mxu1 }
 0x310   : > { %v613_v54 = vpop.f32.mrb[6].mxu1 }
 0x311   : > { %v952_v55 = vpop.f32.mrb[7].mxu1  ;;  %v622_v56 = vsel %vm621_vm4, %v616_v52, -10000.0 }
 0x312   : > { %v623_v57 = vsel %vm569_vm2, %v622_v56, -inf }
 0x313   : > { %624 = vmax.xlane.f32.xlu1 %v623_v57 }
 0x3a0   : > { %v625_v58 = vpop.xlane.xlu1 %624 }
 0x3a1   : > { %v626_v59 = vsub.f32 %v622_v56, %v625_v58 }
 0x3a3   : > { %v627_v60 = vmul.f32 1.442695, %v626_v59 }
 0x3a5   : > { %1048 = vpow2.f32 %v627_v60 }
 0x3af   : > { %v1049_v61 = vpop.eup %1048 }
 0x3b0   : > { %v629_v62 = vsel %vm569_vm2, %v1049_v61, 0.0 }
 0x3b1   : > { %630 = vadd.xlane.f32.xlu1 %v629_v62 }
 0x43e   : > { %v631_v2 = vpop.xlane.xlu1 %630 }
 0x43f   : > { %1050 = vrcp.f32 %v631_v2 }
 0x449   : > { %v1051_v3 = vpop.eup %1050 }
 0x44a   : > { %v633_v4 = vmul.f32 %v1051_v3, %v1049_v61 }
 0x44c   : > { %v634_v5 = vpack.c.bf16 %v633_v4, %v633_v4 }
 0x44e   : > { %956 = vmatmul.mubr.msk.bf16.vlgmr.msra.gmra.mrb[8].mxu0 %vm569_vm2, %v634_v5 }
 0x521   : > { %v677_v6 = vpop.f32.mrb[8].mxu0 }
 0x522   : > { %v683_v7 = vpack.c.bf16 %v677_v6, %v677_v6  ;;  %v957_v8 = vpop.f32.mrb[9].mxu0 }
 0x523   : > { %v680_v9 = vpop.f32.mrb[10].mxu0 }
 0x524   : > { %v958_v10 = vpop.f32.mrb[11].mxu0  ;;  %962 = vmatmul.mubr.msk.bf16.vlgmr.msra.gmra.mrb[8].mxu1 %vm569_vm2, %v683_v7 }
 0x5f4   : > { %734 = sbr.rel (%p901_p0) target bundleno = 1531 (0x5fb), region = 52 }
 0x5f7   : > { %v725_v11 = vpop.f32.mrb[8].mxu1 }
 0x5f8   : > { %v963_v12 = vpop.f32.mrb[9].mxu1 }
 0x5f9   : > { %v728_v13 = vpop.f32.mrb[10].mxu1 }
 0x5fa   : > { %v964_v14 = vpop.f32.mrb[11].mxu1 }
 0x5fb PF: > { %v744_v17 = vld [vmem:[#allocation2] sm:$0xff]  ;;  %p903_p1 = scmp.ne.s32.totalorder %s1130_s27, 3 }
 0x5fc   : > { %v745_v18 = vadd.f32 %v744_v17, %v725_v11  ;;  %vm753_vm5 = vcmask (!%p903_p1), 257024  }
 0x5fd   : > { %750 = sbr.rel (%p903_p1) target bundleno = 1545 (0x609), region = 56 }
 0x5fe   : > { %746 = vst.msk [vmem:[#allocation2] sm:$0xff] %vm345_vm0, %v745_v18 }
 0x605   : > { %v751_v19 = vld [vmem:[#allocation2] sm:$0xff] }
 0x606   : > { %v752_v20 = vpack.c.bf16 %v751_v19, %v751_v19 }
 0x608   : > { %754 = vst.msk [vmem:[%s322_s23] sm:$0xf] %vm753_vm5, %v752_v20 }
 0x609 PF: > { %s905_s19 = sshll.u32 %s1134_s28, 6  ;;  %s769_s9 = sshll.u32 %s322_s23, 4  ;;  %s770_s9 = int_to_ptr.vmem [resolvable:$true] %s769_s9 }
 0x60a   : > { %s1351_s22 = scalar_lea.hbm %s1407_s7, %s905_s19  ;;  %s756_s10 = scalar_lea.sflag [#allocation4], %s320_s18 }
 0x60b   : > { %s1052_s27 = scalar_lea.vmem %s770_s9, 64  ;;  %s1150_s15 = smov [#allocation3]  }
 0x60c   : > { %p1053_p2 = scmp.ne.s32.totalorder %s770_s9, %s1052_s27  ;;  %s1056_s20 = sshll.u32 %s1150_s15, 4  ;;  %s1057_s20 = int_to_ptr.vmem [resolvable:$false] %s1056_s20 }
 0x60d   : > { %s1058_s0 = scalar_lea.vmem %s1057_s20, 128  ;;  %p1059_p6 = scmp.lt.s32.totalorder %s770_s9, %s1057_s20 }
 0x60e   : > { %p1054_p4 = pnand %p1053_p2, %p1240_p3  ;;  %p1060_p7 = scmp.lt.s32.totalorder %s1058_s0, %s1052_s27 }
 0x610   : > { %p1055_p5 = pneg %p1054_p4  ;;  %p1061_p8 = por %p1060_p7, %p1059_p6 }
 0x612   : > { %p1062_p10 = pnand %p1061_p8, %p1055_p5 }
 0x614   : > { %1065 = shalt.err (!%p1062_p10)
}
 0x615   : > { %s1066_s28 = scalar_lea.hbm %s1351_s22, 64  ;;  %s1070_s19 = scalar_lea.hbm %s1407_s7, 128 }
 0x616   : > { %p1067_p11 = scmp.ne.s32.totalorder %s1351_s22, %s1066_s28  ;;  %p1071_p0 = scmp.lt.u32.totalorder %s1351_s22, %s1407_s7 }
 0x617   : > { %p1072_p1 = scmp.lt.u32.totalorder %s1070_s19, %s1066_s28  ;;  %p1074_p4 = scmp.lt.u32.totalorder %s1066_s28, %s1351_s22 }
 0x618   : > { %p1068_p12 = pnand %p1067_p11, %p1240_p3 }
 0x619   : > { %p1073_p2 = por %p1072_p1, %p1071_p0 }
 0x61a   : > { %p1069_p13 = pneg %p1068_p12 }
 0x61b   : > { %p1075_p5 = por %p1074_p4, %p1073_p2 }
 0x61d   : > { %p1076_p6 = pnand %p1075_p5, %p1069_p13 }
 0x61f   : > { %1079 = shalt.err (!%p1076_p6)
}
 0x620   : > { %967 = dma.vmem_to_hbm [thread:$0]  (%p1240_p3), %s770_s9, 64, %s1351_s22, %s756_s10  }
 0x621 PF: > { %p973_p7 = scmp.ge.s32.totalorder %s1146_s8, 2  ;;  %s781_s0 = sand.u32 1, %s1118_s24  }
 0x622   : > { %s782_s27 = scalar_lea.sflag [#allocation4], %s781_s0 }
 0x623   : > { %p970_p8 = pnand %p973_p7, %p1250_p9 }
 0x625   : > { %1113 = dma.done.wait (!%p970_p8), %s782_s27, 64  }
 0x626   : > { %1115 = vsyncadd (!%p970_p8), %s782_s27, 4294967232  ;;  %s20_s8 = sadd.s32 1, %s1146_s8   ;;  %s1412_s24 = smov %s1122_s25 }
 0x627   : > { %p17_p10 = scmp.ge.s32.totalorder %s20_s8, 10   ;;  %s1413_s25 = smov %s1126_s26 }
 0x628   : > { %s1414_s26 = smov %s1258_s17  ;;  %s1415_s27 = smov %s1138_s29 }
 0x629   : > { %s1416_s28 = smov %s1142_s30  ;;  %s1417_s29 = smov %s1420_s11 }
 0x62a   : > { %s1418_s30 = smov %s1424_s12  ;;  %19 = sbr.rel (!%p17_p10) target bundleno = 7 (0x7), region = 100 }
 0x631   :  { %787 = vsyncpa [#allocation4], 1 }
 0x632   :  { %789 = vsyncpa [#allocation4 + $0x1], 1 }

</bundles_post_ra>
